<compile_context>
chip_gen: v5e
topology: v5e:2x2
jax: 0.10.0
libtpu: 0.0.40
codegen_flags: <defaults>
</compile_context>

<pallas_src>
import functools

import jax
import jax.numpy as jnp
from jax.experimental import pallas as pl
from jax.experimental.pallas import tpu as pltpu


def _att_block_kernel(x_ref, w_ref, b_ref, pooled_ref, natt_ref, cla_ref, *,
                      activation, cout_block, matmul_dtype):
    """One (batch b, C_out-tile j) grid step.

    x_ref      : (1, C_in, T)   per-batch activation slab (constant across j)
    w_ref      : (2*tc, C_in)   fused [att ; cla] weight rows for tile j
    b_ref      : (2*tc, 1)      fused [att ; cla] biases for tile j
    pooled_ref : (1, tc, 1)     attention-pooled output
    natt_ref   : (1, tc, T)     softmax(tanh(att(x)))
    cla_ref    : (1, tc, T)     nonlinear_transform(cla(x))
    """
    tc = cout_block
    xb = x_ref[0]                                    # (C_in, T)
    w = w_ref[...]                                   # (2*tc, C_in)
    if matmul_dtype is not None:
        xb = xb.astype(matmul_dtype)
        w = w.astype(matmul_dtype)

    # --- fused 1x1 convs: one MXU pass for both branches --------------------
    y = jnp.dot(w, xb, preferred_element_type=jnp.float32)        # (2*tc, T)
    b = b_ref[...]                                                # (2*tc, 1)
    att = y[:tc, :] + b[:tc, :]                                   # (tc, T)
    cla = y[tc:, :] + b[tc:, :]                                   # (tc, T)

    # --- attention branch: softmax(tanh(.)) over T (lane axis) --------------
    t = jnp.tanh(att)
    m = jnp.max(t, axis=-1, keepdims=True)
    e = jnp.exp(t - m)
    denom = jnp.sum(e, axis=-1, keepdims=True)                    # (tc, 1)
    # tc reciprocals + a VPU multiply instead of tc*T divides on the EUP.
    inv = pl.reciprocal(denom, approx=False)                      # exact (parity)
    norm_att = e * inv

    # --- classification branch ----------------------------------------------
    if activation == "sigmoid":
        cla = jax.nn.sigmoid(cla)
    # activation == "linear" -> identity

    # --- attention-weighted pooling over T -----------------------------------
    # keepdims keeps the natural (tc, 1) sublane layout for the store.
    pooled = jnp.sum(norm_att * cla, axis=-1, keepdims=True)      # (tc, 1)

    pooled_ref[0] = pooled.astype(pooled_ref.dtype)
    natt_ref[0] = norm_att.astype(natt_ref.dtype)
    cla_ref[0] = cla.astype(cla_ref.dtype)


def _padded_tile_bytes(shape, itemsize):
    """VMEM footprint of one tile after (8,128) padding of the minor dims."""
    shape = tuple(int(d) for d in shape)
    if len(shape) == 1:
        shape = (1,) + shape
    lead = 1
    for d in shape[:-2]:
        lead *= d
    sub = -(-shape[-2] // 8) * 8
    lane = -(-shape[-1] // 128) * 128
    return lead * sub * lane * itemsize


def att_block_v2(x, w_att, b_att, w_cla, b_cla, *, activation="linear",
                 cout_block=None, matmul_dtype=None):
    """x: (B, C_in, T); w_*: (C_out, C_in); b_*: (C_out,).

    Returns (pooled (B, C_out), norm_att (B, C_out, T), cla (B, C_out, T)),
    matching PyTorch AttBlockV2.forward.

    cout_block   : C_out tile size (grid axis). None -> C_out (single tile).
                   Must divide C_out and be a multiple of 8 (or equal C_out).
                   Use it on v7x to bound VMEM and feed both TensorCores.
    matmul_dtype : e.g. jnp.bfloat16 to run the MXU matmul in bf16 on v6e/v7x
                   (f32 epilogue); None keeps full f32 parity.
    """
    B, C_in, T = x.shape
    C_out, c_in_w = w_att.shape
    assert c_in_w == C_in and w_cla.shape == (C_out, C_in)

    if cout_block is None:
        cout_block = C_out
    assert C_out % cout_block == 0
    assert cout_block == C_out or cout_block % 8 == 0
    tc = cout_block
    n_j = C_out // tc

    # Fuse att/cla weights per C_out tile:
    #   rows [j*2tc : j*2tc+tc]       -> w_att rows of tile j
    #   rows [j*2tc+tc : (j+1)*2tc]   -> w_cla rows of tile j
    w_f = jnp.concatenate(
        [w_att.reshape(n_j, tc, C_in), w_cla.reshape(n_j, tc, C_in)],
        axis=1).reshape(2 * C_out, C_in)
    b_f = jnp.concatenate(
        [b_att.reshape(n_j, tc), b_cla.reshape(n_j, tc)],
        axis=1).reshape(2 * C_out, 1)
    if matmul_dtype is not None:
        w_f = w_f.astype(matmul_dtype)

    kernel = functools.partial(_att_block_kernel, activation=activation,
                               cout_block=tc, matmul_dtype=matmul_dtype)

    out_shapes = (
        jax.ShapeDtypeStruct((B, C_out, 1), x.dtype),   # pooled (squeezed below)
        jax.ShapeDtypeStruct((B, C_out, T), x.dtype),   # norm_att
        jax.ShapeDtypeStruct((B, C_out, T), x.dtype),   # cla
    )

    in_specs = [
        # x slab: constant across the C_out-tile axis -> not re-DMA'd per j.
        pl.BlockSpec((1, C_in, T), lambda bb, j: (bb, 0, 0)),
        # TODO(synk): mark weights/bias pipeline_mode=pl.Buffered(1) once the
        # target JAX version is confirmed to accept buffer_count=1 (saves one
        # redundant weight buffer in VMEM for large C_out*C_in).
        pl.BlockSpec((2 * tc, C_in), lambda bb, j: (j, 0)),
        pl.BlockSpec((2 * tc, 1), lambda bb, j: (j, 0)),
    ]
    out_specs = [
        pl.BlockSpec((1, tc, 1), lambda bb, j: (bb, j, 0)),
        pl.BlockSpec((1, tc, T), lambda bb, j: (bb, j, 0)),
        pl.BlockSpec((1, tc, T), lambda bb, j: (bb, j, 0)),
    ]

    grid_spec = pltpu.PrefetchScalarGridSpec(
        num_scalar_prefetch=0,
        grid=(B, n_j),
        in_specs=in_specs,
        out_specs=out_specs,
    )

    # --- VMEM budget (double-buffered tiles + f32 intermediates) -------------
    w_isize = (jnp.dtype(matmul_dtype).itemsize
               if matmul_dtype is not None else x.dtype.itemsize)
    est = 2 * (_padded_tile_bytes((1, C_in, T), 4)
               + _padded_tile_bytes((2 * tc, C_in), w_isize)
               + _padded_tile_bytes((2 * tc, 1), 4)
               + _padded_tile_bytes((1, tc, 1), 4)
               + 2 * _padded_tile_bytes((1, tc, T), 4))
    est += 8 * _padded_tile_bytes((2 * tc, T), 4)   # y/e/norm_att/... headroom
    vmem_limit = int(min(max(est, 32 * 1024 * 1024), 128 * 1024 * 1024))

    # --- advisory cost estimate for XLA scheduling ---------------------------
    flops = 2 * B * (2 * C_out) * C_in * T + 8 * B * C_out * T
    transcendentals = B * C_out * T * (3 if activation == "sigmoid" else 2)
    bytes_accessed = (4 * B * C_in * T + w_isize * 2 * C_out * C_in
                      + 4 * 2 * C_out + 4 * B * C_out * (2 * T + 1))

    pooled3, norm_att, cla = pl.pallas_call(
        kernel,
        out_shape=out_shapes,
        grid_spec=grid_spec,
        compiler_params=pltpu.CompilerParams(
            dimension_semantics=("parallel", "parallel"),
            vmem_limit_bytes=vmem_limit),
        cost_estimate=pl.CostEstimate(flops=flops,
                                      transcendentals=transcendentals,
                                      bytes_accessed=bytes_accessed),
    )(x, w_f, b_f)

    return pooled3.reshape(B, C_out), norm_att, cla


def _reference(x, w_att, b_att, w_cla, b_cla, activation="linear"):
    # plain-JAX reference matching the PyTorch forward
    att = jnp.einsum("oc,bct->bot", w_att, x) + b_att[None, :, None]
    norm_att = jax.nn.softmax(jnp.tanh(att), axis=-1)
    cla = jnp.einsum("oc,bct->bot", w_cla, x) + b_cla[None, :, None]
    if activation == "sigmoid":
        cla = jax.nn.sigmoid(cla)
    pooled = jnp.sum(norm_att * cla, axis=2)
    return pooled, norm_att, cla


if __name__ == "__main__":
    # small shapes consistent with AttBlockV2: x is (batch, in_features, time)
    B, C_in, C_out, T = 2, 16, 16, 32

    key = jax.random.PRNGKey(0)
    kx, ka, kc = jax.random.split(key, 3)

    x = jax.random.normal(kx, (B, C_in, T), dtype=jnp.float32)

    # init_layer: Xavier-uniform weights, zero bias (deterministic synthetic init)
    limit = (6.0 / (C_in + C_out)) ** 0.5
    w_att = jax.random.uniform(ka, (C_out, C_in), jnp.float32, -limit, limit)
    w_cla = jax.random.uniform(kc, (C_out, C_in), jnp.float32, -limit, limit)
    b_att = jnp.zeros((C_out,), jnp.float32)
    b_cla = jnp.zeros((C_out,), jnp.float32)

    # 1) f32 path, sigmoid activation, single C_out tile (default)
    out = att_block_v2(x, w_att, b_att, w_cla, b_cla, activation="sigmoid")
    jax.block_until_ready(out)
    ref = _reference(x, w_att, b_att, w_cla, b_cla, activation="sigmoid")
    for got, want in zip(out, ref):
        assert jnp.allclose(got, want, atol=1e-5, rtol=1e-5), "f32/sigmoid mismatch"

    # 2) f32 path, linear activation, tiled C_out (exercises the j grid axis)
    out = att_block_v2(x, w_att, b_att, w_cla, b_cla, activation="linear",
                       cout_block=8)
    jax.block_until_ready(out)
    ref = _reference(x, w_att, b_att, w_cla, b_cla, activation="linear")
    for got, want in zip(out, ref):
        assert jnp.allclose(got, want, atol=1e-5, rtol=1e-5), "f32/linear mismatch"

    # 3) bf16 MXU operands (v6e/v7x fast path), f32 epilogue — looser tolerance
    out = att_block_v2(x, w_att, b_att, w_cla, b_cla, activation="sigmoid",
                       cout_block=8, matmul_dtype=jnp.bfloat16)
    jax.block_until_ready(out)
    ref = _reference(x, w_att, b_att, w_cla, b_cla, activation="sigmoid")
    for got, want in zip(out, ref):
        assert jnp.allclose(got, want, atol=5e-2, rtol=5e-2), "bf16 mismatch"

    print("KERNEL_OK")
</pallas_src>

<mosaic_0001>
module attributes {stable_mosaic.version = 11 : i64} {
  func.func @_att_block_kernel(%arg0: i32, %arg1: i32, %arg2: memref<1x16x32xf32, #tpu.memory_space<vmem>>, %arg3: memref<32x16xf32, #tpu.memory_space<vmem>>, %arg4: memref<32x1xf32, #tpu.memory_space<vmem>>, %arg5: memref<1x16x1xf32, #tpu.memory_space<vmem>>, %arg6: memref<1x16x32xf32, #tpu.memory_space<vmem>>, %arg7: memref<1x16x32xf32, #tpu.memory_space<vmem>>) attributes {dimension_semantics = [#tpu.dimension_semantics<parallel>, #tpu.dimension_semantics<parallel>], iteration_bounds = array<i64: 2, 1>, scalar_prefetch = 0 : i64, scratch_operands = 0 : i64, tpu.core_type = #tpu.core_type<tc>, window_params = [{transform_indices = @transform_0, window_bounds = array<i64: 1, 16, 32>}, {transform_indices = @transform_1, window_bounds = array<i64: 32, 16>}, {transform_indices = @transform_2, window_bounds = array<i64: 32, 1>}, {transform_indices = @transform_3, window_bounds = array<i64: 1, 16, 1>}, {transform_indices = @transform_4, window_bounds = array<i64: 1, 16, 32>}, {transform_indices = @transform_5, window_bounds = array<i64: 1, 16, 32>}]} {
    %c0 = arith.constant 0 : index
    %c0_0 = arith.constant 0 : index
    %c0_1 = arith.constant 0 : index
    %0 = vector.load %arg2[%c0, %c0_0, %c0_1] : memref<1x16x32xf32, #tpu.memory_space<vmem>>, vector<1x16x32xf32>
    %1 = vector.shape_cast %0 : vector<1x16x32xf32> to vector<16x32xf32>
    %c0_2 = arith.constant 0 : index
    %c0_3 = arith.constant 0 : index
    %2 = vector.load %arg3[%c0_2, %c0_3] : memref<32x16xf32, #tpu.memory_space<vmem>>, vector<32x16xf32>
    %cst = arith.constant dense<0.000000e+00> : vector<32x32xf32>
    %3 = tpu.matmul %2, %1, %cst {dimension_numbers = #tpu.dot_dimension_numbers<[1], [0], [0], [1], [0, 0, 1, 1], [], []>} : vector<32x16xf32>, vector<16x32xf32>, vector<32x32xf32> -> vector<32x32xf32>
    %c0_4 = arith.constant 0 : index
    %c0_5 = arith.constant 0 : index
    %4 = vector.load %arg4[%c0_4, %c0_5] : memref<32x1xf32, #tpu.memory_space<vmem>>, vector<32x1xf32>
    %5 = vector.extract_strided_slice %3 {offsets = [0, 0], sizes = [16, 32], strides = [1, 1]} : vector<32x32xf32> to vector<16x32xf32>
    %6 = vector.extract_strided_slice %4 {offsets = [0, 0], sizes = [16, 1], strides = [1, 1]} : vector<32x1xf32> to vector<16x1xf32>
    %7 = vector.broadcast %6 : vector<16x1xf32> to vector<16x32xf32>
    %8 = arith.addf %5, %7 : vector<16x32xf32>
    %9 = vector.extract_strided_slice %3 {offsets = [16, 0], sizes = [16, 32], strides = [1, 1]} : vector<32x32xf32> to vector<16x32xf32>
    %10 = vector.extract_strided_slice %4 {offsets = [16, 0], sizes = [16, 1], strides = [1, 1]} : vector<32x1xf32> to vector<16x1xf32>
    %11 = vector.broadcast %10 : vector<16x1xf32> to vector<16x32xf32>
    %12 = arith.addf %9, %11 : vector<16x32xf32>
    %13 = math.tanh %8 : vector<16x32xf32>
    %cst_6 = arith.constant dense<0xFF800000> : vector<16xf32>
    %14 = vector.multi_reduction <maximumf>, %13, %cst_6 [1] : vector<16x32xf32> to vector<16xf32>
    %15 = vector.shape_cast %14 : vector<16xf32> to vector<16x1xf32>
    %16 = vector.broadcast %15 : vector<16x1xf32> to vector<16x32xf32>
    %17 = arith.subf %13, %16 : vector<16x32xf32>
    %18 = math.exp %17 : vector<16x32xf32>
    %cst_7 = arith.constant dense<0.000000e+00> : vector<16xf32>
    %19 = vector.multi_reduction <add>, %18, %cst_7 [1] : vector<16x32xf32> to vector<16xf32>
    %20 = vector.shape_cast %19 : vector<16xf32> to vector<16x1xf32>
    %21 = tpu.reciprocal %20 : vector<16x1xf32> -> vector<16x1xf32>
    %22 = vector.broadcast %21 : vector<16x1xf32> to vector<16x32xf32>
    %23 = arith.mulf %18, %22 : vector<16x32xf32>
    %24 = arith.negf %12 : vector<16x32xf32>
    %25 = math.exp %24 : vector<16x32xf32>
    %cst_8 = arith.constant 1.000000e+00 : f32
    %26 = vector.broadcast %cst_8 : f32 to vector<16x32xf32>
    %27 = arith.addf %26, %25 : vector<16x32xf32>
    %28 = arith.divf %26, %27 : vector<16x32xf32>
    %29 = arith.mulf %23, %28 : vector<16x32xf32>
    %cst_9 = arith.constant dense<0.000000e+00> : vector<16xf32>
    %30 = vector.multi_reduction <add>, %29, %cst_9 [1] : vector<16x32xf32> to vector<16xf32>
    %31 = vector.shape_cast %30 : vector<16xf32> to vector<16x1xf32>
    %c0_10 = arith.constant 0 : index
    %c0_11 = arith.constant 0 : index
    %c0_12 = arith.constant 0 : index
    %32 = vector.load %arg5[%c0_10, %c0_11, %c0_12] : memref<1x16x1xf32, #tpu.memory_space<vmem>>, vector<1x16x1xf32>
    %33 = vector.shape_cast %32 : vector<1x16x1xf32> to vector<16x1xf32>
    %34 = vector.shape_cast %31 : vector<16x1xf32> to vector<1x16x1xf32>
    tpu.vector_store %arg5[%c0_10, %c0_11, %c0_12], %34 {strides = array<i32>} : memref<1x16x1xf32, #tpu.memory_space<vmem>>, vector<1x16x1xf32>,
    %c0_13 = arith.constant 0 : index
    %c0_14 = arith.constant 0 : index
    %c0_15 = arith.constant 0 : index
    %35 = vector.load %arg6[%c0_13, %c0_14, %c0_15] : memref<1x16x32xf32, #tpu.memory_space<vmem>>, vector<1x16x32xf32>
    %36 = vector.shape_cast %35 : vector<1x16x32xf32> to vector<16x32xf32>
    %37 = vector.shape_cast %23 : vector<16x32xf32> to vector<1x16x32xf32>
    tpu.vector_store %arg6[%c0_13, %c0_14, %c0_15], %37 {strides = array<i32>} : memref<1x16x32xf32, #tpu.memory_space<vmem>>, vector<1x16x32xf32>,
    %c0_16 = arith.constant 0 : index
    %c0_17 = arith.constant 0 : index
    %c0_18 = arith.constant 0 : index
    %38 = vector.load %arg7[%c0_16, %c0_17, %c0_18] : memref<1x16x32xf32, #tpu.memory_space<vmem>>, vector<1x16x32xf32>
    %39 = vector.shape_cast %38 : vector<1x16x32xf32> to vector<16x32xf32>
    %40 = vector.shape_cast %28 : vector<16x32xf32> to vector<1x16x32xf32>
    tpu.vector_store %arg7[%c0_16, %c0_17, %c0_18], %40 {strides = array<i32>} : memref<1x16x32xf32, #tpu.memory_space<vmem>>, vector<1x16x32xf32>,
    return
  }
  func.func @transform_0(%arg0: i32, %arg1: i32) -> (i32, i32, i32) {
    %c0_i32 = arith.constant 0 : i32
    %c0_i32_0 = arith.constant 0 : i32
    %c0_i32_1 = arith.constant 0 : i32
    return %arg0, %c0_i32, %c0_i32_0 : i32, i32, i32
  }
  func.func @transform_1(%arg0: i32, %arg1: i32) -> (i32, i32) {
    %c0_i32 = arith.constant 0 : i32
    %c0_i32_0 = arith.constant 0 : i32
    return %arg1, %c0_i32 : i32, i32
  }
  func.func @transform_2(%arg0: i32, %arg1: i32) -> (i32, i32) {
    %c0_i32 = arith.constant 0 : i32
    %c0_i32_0 = arith.constant 0 : i32
    return %arg1, %c0_i32 : i32, i32
  }
  func.func @transform_3(%arg0: i32, %arg1: i32) -> (i32, i32, i32) {
    %c0_i32 = arith.constant 0 : i32
    %c0_i32_0 = arith.constant 0 : i32
    return %arg0, %arg1, %c0_i32 : i32, i32, i32
  }
  func.func @transform_4(%arg0: i32, %arg1: i32) -> (i32, i32, i32) {
    %c0_i32 = arith.constant 0 : i32
    %c0_i32_0 = arith.constant 0 : i32
    return %arg0, %arg1, %c0_i32 : i32, i32, i32
  }
  func.func @transform_5(%arg0: i32, %arg1: i32) -> (i32, i32, i32) {
    %c0_i32 = arith.constant 0 : i32
    %c0_i32_0 = arith.constant 0 : i32
    return %arg0, %arg1, %c0_i32 : i32, i32, i32
  }
}

</mosaic_0001>

<bundles_post_ra>
// kernel: tpu_custom_call.1
= control target key start
LH: loop header
LB: loop body
LE: loop exit
PB: predicated region body
PF: predicated region fallthrough
CT: control target
= control target key end

     0   :  { %11 = vsyncpa [#allocation3], 0  ;;  %s1202_s0 = inlined_call_operand.vmem [shape: f32[2,16,32], index: 0, kind: input, shape index: {}]   ;;  %s1203_s1 = inlined_call_operand.vmem [shape: f32[32,16], index: 1, kind: input, shape index: {}]   ;;  %s1204_s2 = inlined_call_operand.vmem [shape: f32[32,1], index: 2, kind: input, shape index: {}]   ;;  %s1205_s3 = inlined_call_operand.vmem [shape: f32[2,16,1], index: 3, kind: output, shape index: {0}]   ;;  %s1206_s4 = inlined_call_operand.hbm [shape: f32[2,16,32], index: 4, kind: output, shape index: {1}]   ;;  %s1207_s5 = inlined_call_operand.hbm [shape: f32[2,16,32], index: 5, kind: output, shape index: {2}]  }
   0x1   :  { %13 = vsyncpa [#allocation3 + $0x1], 0 }
   0x2   :  { %14 = vsyncpa [#allocation5], 0 }
   0x3   :  { %16 = vsyncpa [#allocation5 + $0x1], 0  ;;  %s997_s18 = smov 0   ;;  %s999_s19 = smov 0  }
   0x4   :  { %s1001_s20 = smov 0   ;;  %s1003_s21 = smov 0  }
   0x5   :  { %s1005_s22 = smov 0   ;;  %s1007_s23 = smov 0  }
   0x6 LB: > { %s730_s24 = sadd.s32 4294967295, %s962_s23   ;;  %s731_s25 = sadd.s32 4294967294, %s962_s23   ;;  %s962_s23 = sphi %s1007_s23, %s22_s23   ;;  %s958_s22 = sphi %s1005_s22, %s1221_s22   ;;  %s954_s21 = sphi %s1003_s21, %s1220_s21   ;;  %s950_s20 = sphi %s1001_s20, %s1219_s20   ;;  %s946_s19 = sphi %s999_s19, %s1218_s19   ;;  %s942_s18 = sphi %s997_s18, %s1217_s18  }
   0x7   : > { %s34_s26 = sadd.s32 1, %s958_s22  ;;  %s149_s27 = sadd.s32 1, %s950_s20 }
   0x8   : > { %p36_p0 = scmp.ge.s32.totalorder %s34_s26, 2  ;;  %p159_p1 = scmp.ne.s32.totalorder %s950_s20, %s946_s19 }
   0x9   : > { %p160_p2 = scmp.eq.s32.totalorder %s730_s24, 1  ;;  %p165_p3 = scmp.ne.s32.totalorder %s946_s19, %s942_s18 }
   0xa   : > { %s1223_s26 = smov (%p36_p0, %s34_s26), 0  ;;  %p166_p5 = scmp.eq.s32.totalorder %s731_s25, 1 }
   0xb   : > { %p1037_p4 = por %p160_p2, %p159_p1  ;;  %s144_s29 = ssub.s32 %s958_s22, %s1223_s26 }
   0xc   : > { %p736_p6 = scmp.ge.s32.totalorder %s962_s23, 1  ;;  %p147_p7 = scmp.eq.s32.totalorder %s144_s29, 0 }
   0xd   : > { %p1044_p8 = por %p166_p5, %p165_p3  ;;  %p238_p9 = scmp.lt.s32.totalorder %s962_s23, 3 }
   0xe   : > { %s1050_s6 = scalar_select %p147_p7, %s950_s20, %s149_s27  }
   0xf   : > { %p239_p10 = pnand %p736_p6, %p238_p9 }
  0x10   : > { %p290_p11 = scmp.lt.s32.totalorder (!%p239_p10), %s954_s21, 1  ;;  %s1097_s15 = sand.u32 (!%p239_p10), 1, %s946_s19  }
  0x11   : > { %242 = sbr.rel (%p239_p10) target bundleno = 567 (0x237), region = 32  ;;  %s737_s16 = sshll.u32 (!%p239_p10), %s1097_s15, 4 }
  0x12   : > { %s1102_s17 = scalar_lea.vmem (!%p239_p10), [#allocation4], %s737_s16  ;;  %s759_s25 = sshll.u32 (!%p239_p10), %s954_s21, 4 }
  0x13   : > { %s551_s24 = sshll.u32 (!%p239_p10), %s1102_s17, 4  ;;  %s550_s7 = scalar_lea.hbm (!%p239_p10), %s1207_s5, %s759_s25  ;;  %s1114_s24 = int_to_ptr.vmem [resolvable:$true] %s551_s24 }
  0x14   : > { %s1121_s8 = scalar_lea.vmem (!%p239_p10), [#allocation2], %s737_s16  ;;  %s1128_s12 = scalar_lea.hbm (!%p239_p10), %s1206_s4, %s759_s25 }
  0x15   : > { %s553_s14 = sshll.u32 (!%p239_p10), %s550_s7, 4  ;;  %s534_s16 = sshll.u32 (!%p239_p10), %s1128_s12, 4  ;;  %s554_s14 = int_to_ptr.hbm [resolvable:$true] %s553_s14  ;;  %s535_s16 = int_to_ptr.hbm [resolvable:$true] %s534_s16 }
  0x16   : > { %v367_v0 = vld [vmem:[%s1204_s2] sm:$0xff]  ;;  %v964_v1 = vmov 0   ;;  %s1057_s9 = scalar_select %p290_p11, %s954_s21, 1  ;;  %vm325_vm0 = vcmask 130048   ;;  %v322_v5 = vld [vmem:[%s1203_s1 + $0x8] sm:$0xff]  ;;  %v323_v7 = vld [vmem:[%s1203_s1 + $0x10] sm:$0xff] }
  0x17   : > { %830 = vset.pattern.permute.xlu0 %v964_v1  ;;  %831 = vset.pattern.permute.xlu2 %v964_v1  ;;  %v321_v4 = vld [vmem:[%s1203_s1] sm:$0xff]  ;;  %v368_v6 = vld [vmem:[%s1204_s2 + $0x8] sm:$0xff]  ;;  %v324_v8 = vld [vmem:[%s1203_s1 + $0x18] sm:$0xff]  ;;  %vm397_vm1 = vcmask 261120   ;;  %s866_s25 = sshra.s32 %s554_s14, 4  ;;  %s872_s21 = scalar_lea.hbm %s1207_s5, 32  ;;  %s867_s25 = int_to_ptr.hbm [resolvable:$true] %s866_s25 }
  0x18   : > { %373 = vperm.xlu0 %830, %v367_v0   ;;  %s1208_s10 = sshll.u32 %s1057_s9, 4  ;;  %v369_v19 = vld [vmem:[%s1204_s2 + $0x10] sm:$0xff]  ;;  %v370_v20 = vld [vmem:[%s1204_s2 + $0x18] sm:$0xff]  ;;  %s868_s27 = scalar_lea.hbm %s867_s25, 16 }
  0x19   : > { %s294_s13 = scalar_lea.vmem %s1202_s0, %s1208_s10  ;;  %385 = vperm.xlu2 %831, %v369_v19   ;;  %p869_p12 = scmp.ne.s32.totalorder %s867_s25, %s868_s27 }
  0x1a   : > { %v320_v2 = vld [vmem:[%s294_s13 + $0x8] sm:$0xff]  ;;  %v319_v3 = vld [vmem:[%s294_s13] sm:$0xff]  ;;  %p873_p1 = scmp.lt.s32.totalorder %s867_s25, %s1207_s5  ;;  %p874_p2 = scmp.lt.s32.totalorder %s872_s21, %s868_s27 }
  0x1b   : > { %352 = vmatpush.msra.mxu0 %v320_v2  ;;  %761 = vmatpush.msra.mxu1 %v320_v2  ;;  %p870_p13 = pnand %p869_p12, %p1037_p4 }
  0x1c   : > { %762 = vmatpush.msra.mxu2 %v320_v2  ;;  %763 = vmatpush.msra.mxu3 %v320_v2  ;;  %p875_p3 = por %p874_p2, %p873_p1 }
  0x1d   : > { %353 = vmatpush.msra.mxu0 %v319_v3  ;;  %764 = vmatpush.msra.mxu1 %v319_v3  ;;  %p871_p0 = pneg %p870_p13 }
  0x1e   : > { %743 = vmatmul.msk.f32.vlgmr.msra.gmra.mxu0 %vm325_vm0, %v321_v4  ;;  %744 = vmatmul.msk.f32.vlgmr.msra.gmra.mxu1 %vm325_vm0, %v322_v5 }
  0x1f   : > { %765 = vmatpush.msra.mxu2 %v319_v3  ;;  %766 = vmatpush.msra.mxu3 %v319_v3  ;;  %p876_p5 = pnand %p875_p3, %p871_p0 }
  0x20   : > { %378 = vperm.xlu0 %830, %v368_v6   ;;  %745 = vmatmul.msk.f32.vlgmr.msra.gmra.mxu2 %vm325_vm0, %v323_v7 }
  0x21   : > { %746 = vmatmul.msk.f32.vlgmr.msra.gmra.mxu3 %vm325_vm0, %v324_v8  ;;  %390 = vperm.xlu2 %831, %v370_v20  }
  0x73   : > { %v386_v32 = vpop.permute.xlu2 %385 }
  0x7b   : > { %v391_v36 = vpop.permute.xlu2 %390 }
  0x8a   : > { %v374_v9 = vpop.permute.xlu0 %373 }
  0x92   : > { %v379_v12 = vpop.permute.xlu0 %378 }
  0x9b   : > { %v355_v10 = vpop.f32.mrf.mxu0  ;;  %v358_v13 = vpop.f32.mrf.mxu1 }
  0x9c   : > { %v381_v11 = vadd.f32 %v374_v9, %v355_v10  ;;  %v382_v14 = vadd.f32 %v379_v12, %v358_v13 }
  0x9e   : > { %832 = vtanh.f32 %v381_v11 }
  0x9f   : > { %834 = vtanh.f32 %v382_v14 }
  0xa3   : > { %v361_v31 = vpop.f32.mrf.mxu2 }
  0xa4   : > { %v833_v15 = vpop.eup %832  ;;  %v393_v33 = vadd.f32 %v386_v32, %v361_v31  ;;  %v364_v35 = vpop.f32.mrf.mxu3 }
  0xa5   : > { %v398_v16 = vsel %vm397_vm1, %v833_v15, -inf  ;;  %v835_v17 = vpop.eup %834  ;;  %v394_v37 = vadd.f32 %v391_v36, %v364_v35 }
  0xa6   : > { %399 = vmax.xlane.f32.xlu1 %v398_v16  ;;  %v401_v18 = vsel %vm397_vm1, %v835_v17, -inf  ;;  %v747_v34 = vmul.f32 -1.442695, %v393_v33 }
  0xa7   : > { %v748_v38 = vmul.f32 -1.442695, %v394_v37 }
  0xae   : > { %402 = vmax.xlane.f32.xlu1 %v401_v18 }
 0x119   : > { %v400_v21 = vpop.xlane.xlu1 %399 }
 0x11a   : > { %v404_v22 = vsub.f32 %v833_v15, %v400_v21 }
 0x11c   : > { %v406_v23 = vmul.f32 1.442695, %v404_v22 }
 0x11e   : > { %836 = vpow2.f32 %v406_v23 }
 0x121   : > { %v403_v24 = vpop.xlane.xlu1 %402 }
 0x122   : > { %v405_v25 = vsub.f32 %v835_v17, %v403_v24 }
 0x124   : > { %v1088_v26 = vpop.eup %836  ;;  %v408_v27 = vmul.f32 1.442695, %v405_v25 }
 0x125   : > { %v410_v28 = vsel %vm397_vm1, %v1088_v26, 0.0 }
 0x126   : > { %838 = vpow2.f32 %v408_v27  ;;  %411 = vadd.xlane.f32.xlu0 %v410_v28 }
 0x127   : > { %840 = vpow2.f32 %v747_v34 }
 0x128   : > { %842 = vpow2.f32 %v748_v38 }
 0x12c   : > { %v1092_v29 = vpop.eup %838 }
 0x12d   : > { %v413_v30 = vsel %vm397_vm1, %v1092_v29, 0.0  ;;  %v841_v39 = vpop.eup %840 }
 0x12e   : > { %414 = vadd.xlane.f32.xlu1 %v413_v30  ;;  %v452_v40 = vadd.f32 1.0, %v841_v39  ;;  %v843_v41 = vpop.eup %842 }
 0x12f   : > { %v453_v42 = vadd.f32 1.0, %v843_v41 }
 0x130   : > { %844 = vrcp.f32 %v452_v40  ;;  %v465_v51 = vand.u32 2147483648, %v452_v40  ;;  %vm459_vm2 = vweird.f32 %v452_v40  ;;  %v463_v54 = vand.u32 2147483647, %v452_v40 }
 0x131   : > { %846 = vrcp.f32 %v453_v42  ;;  %v480_v52 = vand.u32 2147483648, %v453_v42  ;;  %vm474_vm5 = vweird.f32 %v453_v42  ;;  %v478_v58 = vand.u32 2147483647, %v453_v42 }
 0x132   : > { %v466_v55 = vor.u32 1.1754944e-38, %v465_v51  ;;  %vm464_vm7 = vcmp.eq.f32.partialorder %v463_v54, 8.507059e+37 }
 0x133   : > { %v481_v59 = vor.u32 1.1754944e-38, %v480_v52  ;;  %vm479_vm9 = vcmp.eq.f32.partialorder %v478_v58, 8.507059e+37 }
 0x136   : > { %v845_v43 = vpop.eup %844 }
 0x137   : > { %v847_v44 = vpop.eup %846  ;;  %v455_v45 = vmul.f32 %v845_v43, %v452_v40  ;;  %vm460_vm3 = vweird.f32 %v845_v43 }
 0x138   : > { %v470_v46 = vmul.f32 %v847_v44, %v453_v42  ;;  %vm461_vm4 = vmor %vm459_vm2, %vm460_vm3  ;;  %vm475_vm6 = vweird.f32 %v847_v44 }
 0x139   : > { %v456_v47 = vsub.f32 1.0, %v455_v45  ;;  %vm476_vm8 = vmor %vm474_vm5, %vm475_vm6 }
 0x13a   : > { %v471_v48 = vsub.f32 1.0, %v470_v46 }
 0x13b   : > { %v457_v49 = vmul.f32 %v845_v43, %v456_v47 }
 0x13c   : > { %v472_v50 = vmul.f32 %v847_v44, %v471_v48 }
 0x13d   : > { %v458_v53 = vadd.f32 %v845_v43, %v457_v49 }
 0x13e   : > { %v473_v56 = vadd.f32 %v847_v44, %v472_v50 }
 0x13f   : > { %v462_v57 = vsel %vm461_vm4, %v845_v43, %v458_v53 }
 0x140   : > { %v467_v60 = vsel %vm464_vm7, %v466_v55, %v462_v57  ;;  %v477_v61 = vsel %vm476_vm8, %v847_v44, %v473_v56 }
 0x141   : > { %497 = vst.msk [vmem:[%s1102_s17] sm:$0xff] %vm397_vm1, %v467_v60  ;;  %v1106_v62 = vsel %vm479_vm9, %v481_v59, %v477_v61 }
 0x142   : > { %498 = vst.msk [vmem:[%s1102_s17 + $0x8] sm:$0xff] %vm397_vm1, %v1106_v62  ;;  %s514_s17 = scalar_lea.sflag [#allocation5], %s1097_s15 }
 0x199   : > { %v412_v63 = vpop.xlane.xlu0 %411 }
 0x19a   : > { %848 = vrcp.f32 %v412_v63  ;;  %v427_v4 = vand.u32 2147483648, %v412_v63  ;;  %v425_v6 = vand.u32 2147483647, %v412_v63  ;;  %vm421_vm11 = vweird.f32 %v412_v63 }
 0x19c   : > { %v428_v9 = vor.u32 1.1754944e-38, %v427_v4  ;;  %vm426_vm13 = vcmp.eq.f32.partialorder %v425_v6, 8.507059e+37 }
 0x1a0   : > { %v849_v0 = vpop.eup %848 }
 0x1a1   : > { %v417_v1 = vmul.f32 %v849_v0, %v412_v63  ;;  %v415_v2 = vpop.xlane.xlu1 %414  ;;  %vm422_vm10 = vweird.f32 %v849_v0 }
 0x1a2   : > { %850 = vrcp.f32 %v415_v2  ;;  %vm423_vm12 = vmor %vm421_vm11, %vm422_vm10  ;;  %v441_v15 = vand.u32 2147483648, %v415_v2  ;;  %v439_v18 = vand.u32 2147483647, %v415_v2  ;;  %vm435_vm15 = vweird.f32 %v415_v2 }
 0x1a3   : > { %v418_v3 = vsub.f32 1.0, %v417_v1 }
 0x1a4   : > { %v442_v22 = vor.u32 1.1754944e-38, %v441_v15  ;;  %vm1139_vm2 = vcmp.eq.f32.partialorder %v439_v18, 8.507059e+37 }
 0x1a5   : > { %v419_v5 = vmul.f32 %v849_v0, %v418_v3 }
 0x1a7   : > { %v420_v7 = vadd.f32 %v849_v0, %v419_v5 }
 0x1a8   : > { %v851_v8 = vpop.eup %850 }
 0x1a9   : > { %v431_v10 = vmul.f32 %v851_v8, %v415_v2  ;;  %v424_v11 = vsel %vm423_vm12, %v849_v0, %v420_v7  ;;  %vm436_vm14 = vweird.f32 %v851_v8 }
 0x1aa   : > { %v429_v12 = vsel %vm426_vm13, %v428_v9, %v424_v11  ;;  %vm1132_vm0 = vmor %vm435_vm15, %vm436_vm14 }
 0x1ab   : > { %v432_v13 = vsub.f32 1.0, %v431_v10  ;;  %v444_v14 = vmul.f32 %v1088_v26, %v429_v12 }
 0x1ad   : > { %v433_v16 = vmul.f32 %v851_v8, %v432_v13  ;;  %v484_v17 = vmul.f32 %v467_v60, %v444_v14  ;;  %495 = vst.msk [vmem:[%s1121_s8] sm:$0xff] %vm397_vm1, %v444_v14 }
 0x1af   : > { %v486_v19 = vsel %vm397_vm1, %v484_v17, 0.0  ;;  %v434_v20 = vadd.f32 %v851_v8, %v433_v16 }
 0x1b0   : > { %487 = vadd.xlane.f32.xlu2 %v486_v19 }
 0x1b1   : > { %v438_v23 = vsel %vm1132_vm0, %v851_v8, %v434_v20 }
 0x1b2   : > { %879 = shalt.err (!%p876_p5)
}
 0x1b3   : > { %s965_s10 = smov 128   ;;  %s966_s13 = smov 8   ;;  %v443_v25 = vsel %vm1139_vm2, %v442_v22, %v438_v23 }
 0x1b4   : > { %768 = dma.vmem_to_hbm [thread:$0]  (%p1037_p4), %s1114_s24, 256, %s554_s14, %s514_s17, %s965_s10, %s965_s10, %s966_s13   ;;  %v445_v26 = vmul.f32 %v1092_v29, %v443_v25 }
 0x1b5   : > { %s1215_s25 = sshll.u32 %s1121_s8, 4  ;;  %s509_s27 = scalar_lea.sflag [#allocation3], %s1097_s15  ;;  %s533_s25 = int_to_ptr.vmem [resolvable:$true] %s1215_s25 }
 0x1b6   : > { %v485_v27 = vmul.f32 %v1106_v62, %v445_v26  ;;  %496 = vst.msk [vmem:[%s1121_s8 + $0x8] sm:$0xff] %vm397_vm1, %v445_v26  ;;  %s894_s29 = sshra.s32 %s535_s16, 4  ;;  %s900_s17 = scalar_lea.hbm %s1206_s4, 32  ;;  %s895_s29 = int_to_ptr.hbm [resolvable:$true] %s894_s29 }
 0x1b7   : > { %s896_s7 = scalar_lea.hbm %s895_s29, 16  ;;  %p901_p10 = scmp.lt.s32.totalorder %s895_s29, %s1206_s4 }
 0x1b8   : > { %p897_p6 = scmp.ne.s32.totalorder %s895_s29, %s896_s7  ;;  %p902_p11 = scmp.lt.s32.totalorder %s900_s17, %s896_s7 }
 0x1ba   : > { %p898_p7 = pnand %p897_p6, %p1037_p4  ;;  %p903_p12 = por %p902_p11, %p901_p10 }
 0x1bc   : > { %p899_p9 = pneg %p898_p7 }
 0x1be   : > { %p904_p13 = pnand %p903_p12, %p899_p9 }
 0x1c0   : > { %907 = shalt.err (!%p904_p13)
}
 0x1c1   : > { %767 = dma.vmem_to_hbm [thread:$0]  (%p1037_p4), %s533_s25, 256, %s535_s16, %s509_s27, %s965_s10, %s965_s10, %s966_s13   ;;  %v489_v28 = vsel %vm397_vm1, %v485_v27, 0.0  ;;  %vm492_vm3 = vcmask 7168  }
 0x1c2   : > { %490 = vadd.xlane.f32.xlu1 %v489_v28  ;;  %s1216_s15 = sshll.u32 %s1057_s9, 4 }
 0x1c3   : > { %s315_s24 = scalar_lea.vmem %s1205_s3, %s1216_s15 }
 0x223   : > { %v488_v29 = vpop.xlane.xlu2 %487 }
 0x224   : > { %493 = vst.msk [vmem:[%s315_s24] sm:$0xff] %vm492_vm3, %v488_v29 }
 0x235   : > { %v491_v30 = vpop.xlane.xlu1 %490 }
 0x236   : > { %494 = vst.msk [vmem:[%s315_s24 + $0x8] sm:$0xff] %vm492_vm3, %v491_v30 }
 0x237 PF: > { %p778_p0 = scmp.ge.s32.totalorder %s962_s23, 2  ;;  %s580_s28 = sand.u32 1, %s942_s18  }
 0x238   : > { %s581_s10 = scalar_lea.sflag [#allocation3], %s580_s28 }
 0x239   : > { %p772_p4 = pnand %p778_p0, %p1044_p8 }
 0x23b   : > { %p773_p1 = pneg %p772_p4 }
 0x23d   : > { %933 = dma.done.wait (%p773_p1), %s581_s10, 256  }
 0x23e   : > { %935 = vsyncadd (%p773_p1), %s581_s10, 4294967040  ;;  %s591_s9 = scalar_lea.sflag [#allocation5], %s580_s28 }
 0x23f   : > { %937 = dma.done.wait (%p773_p1), %s591_s9, 256  }
 0x240   : > { %939 = vsyncadd (%p773_p1), %s591_s9, 4294967040  ;;  %s22_s23 = sadd.s32 1, %s962_s23   ;;  %s1217_s18 = smov %s946_s19 }
 0x241   : > { %p19_p2 = scmp.ge.s32.totalorder %s22_s23, 4   ;;  %s1218_s19 = smov %s950_s20 }
 0x242   : > { %s1219_s20 = smov %s1050_s6  ;;  %s1220_s21 = smov %s958_s22 }
 0x243   : > { %s1221_s22 = smov %s1223_s26  ;;  %21 = sbr.rel (!%p19_p2) target bundleno = 6 (0x6), region = 102 }
 0x248   :  { %597 = vsyncpa [#allocation3], 1 }
 0x249   :  { %599 = vsyncpa [#allocation3 + $0x1], 1 }
 0x24a   :  { %600 = vsyncpa [#allocation5], 1 }
 0x24b   :  { %602 = vsyncpa [#allocation5 + $0x1], 1 }

</bundles_post_ra>
